<compile_context>
chip_gen: v7x
topology: tpu7x:2x2x1
jax: 0.10.0
libtpu: 0.0.40
codegen_flags: <defaults>
</compile_context>

<pallas_src>
import functools

import jax
import jax.numpy as jnp
from jax.experimental import pallas as pl
from jax.experimental.pallas import tpu as pltpu


def _softmax_rows(x):
    m = jnp.max(x, axis=-1, keepdims=True)
    e = jnp.exp(x - m)
    return e / jnp.sum(e, axis=-1, keepdims=True)


def _attn_dot_kernel(h_ref, encT_ref, out_ref):
    # energies[b, i] = hidden[b] . encoder_outputs[i]
    # h_ref: (B, H), encT_ref: (H, S)  -> natural (M,K)x(K,N) MXU layout, S on lanes.
    energies = jnp.dot(h_ref[...], encT_ref[...], preferred_element_type=jnp.float32)
    out_ref[...] = _softmax_rows(energies)


def _attn_general_kernel(h_ref, encT_ref, w_ref, b_ref, out_ref):
    # hidden . (W e_i + b) == (hidden @ W) . e_i + hidden . b   (W in torch (out,in) layout)
    u = jnp.dot(h_ref[...], w_ref[...], preferred_element_type=jnp.float32)    # (B, H)
    hb = jnp.sum(h_ref[...] * b_ref[...], axis=-1, keepdims=True)              # (B, 1)
    energies = jnp.dot(u, encT_ref[...], preferred_element_type=jnp.float32) + hb  # (B, S)
    out_ref[...] = _softmax_rows(energies)


_VMEM = pl.BlockSpec(memory_space=pltpu.MemorySpace.VMEM)


def prepare_encoder_outputs(encoder_outputs):
    """One-time per-sequence prep: (S, 1, H) -> enc_T of shape (H, S), f32.

    Do this OUTSIDE the decoder loop; it amortizes to ~zero and lets the kernel
    consume the encoder tile in natural (K, N) MXU layout with no per-call XLU
    relayout.
    """
    S = encoder_outputs.shape[0]
    H = encoder_outputs.shape[-1]
    return encoder_outputs.reshape(S, H).astype(jnp.float32).T  # (H, S)


@functools.partial(jax.jit, static_argnames=("method",))
def attn_forward(method, hidden, enc_T, attn_weight=None, attn_bias=None):
    """hidden (1,H) f32, enc_T (H,S) f32 (from prepare_encoder_outputs)
    -> attention weights (1,1,S) f32, matching Attn.forward."""
    H, S = enc_T.shape
    h2 = hidden.reshape(-1, H).astype(jnp.float32)   # (B, H); module-faithful B = 1
    B = h2.shape[0]

    if method == "dot":
        out = pl.pallas_call(
            _attn_dot_kernel,
            out_shape=jax.ShapeDtypeStruct((B, S), jnp.float32),
            in_specs=[_VMEM, _VMEM],
            out_specs=_VMEM,
        )(h2, enc_T)
    elif method == "general":
        w = attn_weight.astype(jnp.float32)                  # torch Linear layout (H_out, H_in)
        b = attn_bias.reshape(1, H).astype(jnp.float32)
        out = pl.pallas_call(
            _attn_general_kernel,
            out_shape=jax.ShapeDtypeStruct((B, S), jnp.float32),
            in_specs=[_VMEM, _VMEM, _VMEM, _VMEM],
            out_specs=_VMEM,
        )(h2, enc_T, w, b)
    else:
        # TODO(synk): method='concat' -- the reference score() dots with self.v, which is
        # never defined in the PyTorch module (only self.other exists), so this path
        # cannot be reproduced faithfully.
        raise NotImplementedError("method='concat' not supported (undefined self.v in the spec)")

    # match PyTorch: softmax(energies).unsqueeze(0).unsqueeze(0) -> (1, 1, S)
    return out.reshape(1, 1, B * S) if B == 1 else out.reshape(B, 1, S)


def attn_reference(method, hidden, encoder_outputs, attn_weight=None, attn_bias=None):
    """Pure-JAX mirror of Attn.forward (explicit loop over i, then softmax over seq)."""
    S = encoder_outputs.shape[0]
    h = hidden.reshape(-1)
    energies = []
    for i in range(S):
        e = encoder_outputs[i].reshape(-1)
        if method == "dot":
            energies.append(jnp.dot(h, e))
        elif method == "general":
            energies.append(jnp.dot(h, e @ attn_weight.T + attn_bias))
    energies = jnp.stack(energies)
    return jax.nn.softmax(energies).reshape(1, 1, S)


if __name__ == "__main__":
    SEQ_LEN = 8      # number of encoder outputs (<= MAX_LENGTH)
    HIDDEN = 32      # hidden_size

    key = jax.random.PRNGKey(0)
    k_h, k_e, k_w, k_b = jax.random.split(key, 4)
    hidden = jax.random.normal(k_h, (1, HIDDEN), jnp.float32)
    encoder_outputs = jax.random.normal(k_e, (SEQ_LEN, 1, HIDDEN), jnp.float32)
    scale = 1.0 / jnp.sqrt(HIDDEN)
    attn_weight = jax.random.uniform(k_w, (HIDDEN, HIDDEN), jnp.float32, -scale, scale)
    attn_bias = jax.random.uniform(k_b, (HIDDEN,), jnp.float32, -scale, scale)

    # One-time per-sequence prep (outside the decoder loop).
    enc_T = jax.block_until_ready(prepare_encoder_outputs(encoder_outputs))

    for method in ("dot", "general"):
        out = attn_forward(method, hidden, enc_T, attn_weight, attn_bias)
        jax.block_until_ready(out)
        ref = attn_reference(method, hidden, encoder_outputs, attn_weight, attn_bias)
        assert out.shape == (1, 1, SEQ_LEN), f"bad shape for method={method}: {out.shape}"
        assert jnp.allclose(out, ref, atol=1e-5), f"mismatch vs reference for method={method}"
        assert jnp.allclose(jnp.sum(out), 1.0, atol=1e-5), f"softmax not normalized ({method})"

    print("KERNEL_OK")
</pallas_src>

<mosaic_0001>
module attributes {stable_mosaic.version = 11 : i64} {
  func.func @_attn_dot_kernel(%arg0: memref<1x32xf32, #tpu.memory_space<vmem>>, %arg1: memref<32x8xf32, #tpu.memory_space<vmem>>, %arg2: memref<1x8xf32, #tpu.memory_space<vmem>>) attributes {dimension_semantics = [], scalar_prefetch = 0 : i64, scratch_operands = 0 : i64, tpu.core_type = #tpu.core_type<tc>} {
    %c0 = arith.constant 0 : index
    %c0_0 = arith.constant 0 : index
    %0 = vector.load %arg0[%c0, %c0_0] : memref<1x32xf32, #tpu.memory_space<vmem>>, vector<1x32xf32>
    %c0_1 = arith.constant 0 : index
    %c0_2 = arith.constant 0 : index
    %1 = vector.load %arg1[%c0_1, %c0_2] : memref<32x8xf32, #tpu.memory_space<vmem>>, vector<32x8xf32>
    %cst = arith.constant dense<0.000000e+00> : vector<1x8xf32>
    %2 = tpu.matmul %0, %1, %cst {dimension_numbers = #tpu.dot_dimension_numbers<[1], [0], [0], [1], [0, 0, 1, 1], [], []>} : vector<1x32xf32>, vector<32x8xf32>, vector<1x8xf32> -> vector<1x8xf32>
    %cst_3 = arith.constant dense<0xFF800000> : vector<1xf32>
    %3 = vector.multi_reduction <maximumf>, %2, %cst_3 [1] : vector<1x8xf32> to vector<1xf32>
    %4 = vector.shape_cast %3 : vector<1xf32> to vector<1x1xf32>
    %5 = vector.broadcast %4 : vector<1x1xf32> to vector<1x8xf32>
    %6 = arith.subf %2, %5 : vector<1x8xf32>
    %7 = math.exp %6 : vector<1x8xf32>
    %cst_4 = arith.constant dense<0.000000e+00> : vector<1xf32>
    %8 = vector.multi_reduction <add>, %7, %cst_4 [1] : vector<1x8xf32> to vector<1xf32>
    %9 = vector.shape_cast %8 : vector<1xf32> to vector<1x1xf32>
    %10 = vector.broadcast %9 : vector<1x1xf32> to vector<1x8xf32>
    %11 = arith.divf %7, %10 : vector<1x8xf32>
    %c0_5 = arith.constant 0 : index
    %c0_6 = arith.constant 0 : index
    %12 = vector.load %arg2[%c0_5, %c0_6] : memref<1x8xf32, #tpu.memory_space<vmem>>, vector<1x8xf32>
    tpu.vector_store %arg2[%c0_5, %c0_6], %11 {strides = array<i32>} : memref<1x8xf32, #tpu.memory_space<vmem>>, vector<1x8xf32>,
    return
  }
}

</mosaic_0001>

<bundles_post_ra>
// kernel: attn_forward.1
= control target key start
LH: loop header
LB: loop body
LE: loop exit
PB: predicated region body
PF: predicated region fallthrough
CT: control target
= control target key end

     0   :  { %v173_v3 = vmov 0.0|0.0   ;;  %vm174_vm0 = vmmov 0   ;;  %v175_v6 = vmov 0.0   ;;  %s222_s0 = inlined_call_operand.vmem [shape: f32[1,32], index: 0, kind: input, shape index: {}]   ;;  %s223_s1 = inlined_call_operand.vmem [shape: f32[32,8], index: 1, kind: input, shape index: {}]   ;;  %s224_s2 = inlined_call_operand.hbm [shape: f32[1,8], index: 2, kind: output, shape index: {}]  }
   0x1   :  { %v13_v0 = vld [vmem:[%s223_s1] sm:$0xff]  ;;  %v14_v1 = vld [vmem:[%s223_s1 + $0x8] sm:$0xff]  ;;  %v15_v2 = vld [vmem:[%s223_s1 + $0x10] sm:$0xff]  ;;  %135 = vmatprep.subr.bf16.mxu0 %v173_v3  ;;  %132 = vmatprep.mubr.msk.f32.mxu0 %vm174_vm0, %v175_v6 }
   0x2   :  { %v136_v4 = vpack.c.bf16 %v14_v1, %v13_v0  ;;  %v16_v5 = vld [vmem:[%s223_s1 + $0x18] sm:$0xff] }
   0x3   :  { %7 = vsyncpa [#allocation3], 0  ;;  %v139_v7 = vpack.c.bf16 %v16_v5, %v15_v2  ;;  %v12_v8 = vld [vmem:[%s222_s0] sm:$0x1]  ;;  %vm17_vm1 = vcmask 261120   ;;  %vm91_vm2 = vcmask 57344  }
   0x4   :  { %137 = vmatpush3.bf16.msra.mxu0 %v136_v4  ;;  %s176_s1 = smov [#allocation2]  }
   0x5   :  { %138 = vmatprep.subr.bf16.mxu0 %v173_v3  ;;  %s110_s0 = sshll.u32 %s176_s1, 4  ;;  %s111_s0 = int_to_ptr.vmem [resolvable:$true] %s110_s0 }
   0x6   :  { %s149_s19 = scalar_lea.vmem %s111_s0, 16  ;;  %s153_s20 = scalar_lea.vmem %s111_s0, 32 }
   0x7   :  { %p150_p0 = scmp.ne.s32.totalorder %s111_s0, %s149_s19  ;;  %p154_p1 = scmp.lt.s32.totalorder %s111_s0, %s111_s0 }
   0x8   :  { %140 = vmatpush3.bf16.msra.mxu0 %v139_v7  ;;  %p155_p2 = scmp.lt.s32.totalorder %s153_s20, %s149_s19 }
   0xa   :  { %p156_p3 = por %p155_p2, %p154_p1 }
   0xb   :  { %133 = vmatmul.mubr.msk.f32.vlgmr.msra.gmra.mrb[0].mxu0 %vm17_vm1, %v12_v8 }
   0xc   :  { %p157_p4 = pnand %p156_p3, %p150_p0 }
  0xde   :  { %v87_v9 = vpop.f32.mrb[0].mxu0 }
  0xdf   :  { %v134_v10 = vpop.f32.mrb[1].mxu0  ;;  %v92_v11 = vsel %vm91_vm2, %v87_v9, -inf }
  0xe0   :  { %93 = vmax.xlane.f32.xlu0 %v92_v11 }
 0x16d   :  { %v94_v12 = vpop.xlane.xlu0 %93 }
 0x16e   :  { %v95_v13 = vsub.f32 %v87_v9, %v94_v12 }
 0x170   :  { %v96_v14 = vmul.f32 1.442695, %v95_v13 }
 0x172   :  { %145 = vpow2.f32 %v96_v14 }
 0x17c   :  { %v146_v15 = vpop.eup %145 }
 0x17d   :  { %v98_v16 = vsel %vm91_vm2, %v146_v15, 0.0 }
 0x17e   :  { %99 = vadd.xlane.f32.xlu0 %v98_v16 }
 0x20b   :  { %v100_v17 = vpop.xlane.xlu0 %99 }
 0x20c   :  { %147 = vrcp.f32 %v100_v17 }
 0x216   :  { %v148_v18 = vpop.eup %147 }
 0x217   :  { %v102_v19 = vmul.f32 %v148_v18, %v146_v15 }
 0x219   :  { %103 = vst.msk [vmem:[#allocation2] sm:$0x1] %vm91_vm2, %v102_v19 }
 0x21a   :  { %160 = shalt.err (!%p157_p4)
}
 0x21b   :  { %s161_s23 = scalar_lea.hbm %s224_s2, 16 }
 0x21c   :  { %p162_p5 = scmp.ne.s32.totalorder %s224_s2, %s161_s23  ;;  %p165_p6 = scmp.lt.u32.totalorder %s161_s23, %s224_s2 }
 0x21e   :  { %p167_p7 = pnand %p165_p6, %p162_p5 }
 0x220   :  { %170 = shalt.err (!%p167_p7)
}
 0x221   :  { %113 = dma.vmem_to_hbm [thread:$0]  %s111_s0, 16, %s224_s2, [#allocation3]  }
 0x222   :  { %171 = dma.done.wait [#allocation3], 16  }
 0x223   :  { %172 = vsyncadd [#allocation3], 4294967280 }
 0x224   :  { %117 = vsyncpa [#allocation3], 1 }

</bundles_post_ra>
